<compile_context>
chip_gen: v7x
topology: tpu7x:2x2x1
jax: 0.10.0
libtpu: 0.0.40
codegen_flags: <defaults>
</compile_context>

<pallas_src>
import jax
import jax.numpy as jnp
from jax.experimental import pallas as pl
from jax.experimental.pallas import tpu as pltpu

_LANE = 128                       # vreg lane width
_MAX_DMA_CHUNKS = 8               # max concurrent DMAs for large tensors
_MIN_BYTES_PER_CHUNK = 1 << 20    # only chunk when >= 2 * 1 MiB total


def _plan_row_chunks(rows, cols, itemsize):
    """Static (start, size) row ranges; each chunk is one contiguous HBM region."""
    sub = max(8, 32 // max(1, itemsize))          # sublane packing multiple
    total_bytes = rows * cols * itemsize
    if rows < 2 * sub or total_bytes < 2 * _MIN_BYTES_PER_CHUNK:
        return ((0, rows),)                       # single DMA
    n_chunks = int(min(_MAX_DMA_CHUNKS,
                       total_bytes // _MIN_BYTES_PER_CHUNK,
                       rows // sub))
    n_chunks = max(1, n_chunks)
    # ceil(rows / n_chunks) rounded up to a sublane multiple -> aligned offsets.
    base = ((rows + n_chunks - 1) // n_chunks + sub - 1) // sub * sub
    base = max(sub, base)
    chunks, start = [], 0
    while start < rows:
        size = min(base, rows - start)
        chunks.append((start, size))
        start += size
    return tuple(chunks)


def _make_identity_dma_kernel(chunks):
    """Kernel: start all HBM->HBM row-chunk DMAs, then wait on all of them."""
    def kernel(x_ref, o_ref, sems):
        copies = []
        for i, (start, size) in enumerate(chunks):
            copies.append(pltpu.make_async_copy(
                x_ref.at[pl.ds(start, size), :],
                o_ref.at[pl.ds(start, size), :],
                sems.at[i]))
        for cp in copies:
            cp.start()
        for cp in copies:
            cp.wait()
    return kernel


@jax.jit
def _identity_pallas_2d(x2d):
    rows, cols = x2d.shape
    itemsize = x2d.dtype.itemsize
    chunks = _plan_row_chunks(rows, cols, itemsize)
    nbytes = rows * cols * itemsize
    return pl.pallas_call(
        _make_identity_dma_kernel(chunks),
        out_shape=jax.ShapeDtypeStruct((rows, cols), x2d.dtype),
        in_specs=[pl.BlockSpec(memory_space=pl.ANY)],    # raw HBM ref
        out_specs=pl.BlockSpec(memory_space=pl.ANY),     # raw HBM ref
        scratch_shapes=[pltpu.SemaphoreType.DMA((len(chunks),))],
        cost_estimate=pl.CostEstimate(
            flops=0, transcendentals=0, bytes_accessed=2 * nbytes),
    )(x2d)


def _as_2d(x):
    """Free layout plumbing: contiguous 2-D slab, lane-dense width if possible."""
    total = x.size
    for cols in (1024, 512, 256, _LANE):
        if total % cols == 0:
            return x.reshape(total // cols, cols)
    # Ragged size: one long row -> one contiguous DMA (avoids tiny strided
    # segments / masked stores that a narrow last dim would cause).
    return x.reshape(1, total)


def identity(x):
    """Identity forward pass implemented as a Pallas TPU kernel (HBM->HBM DMA)."""
    orig_shape = x.shape
    if x.size == 0:
        return x  # nothing to copy
    x2d = _as_2d(x)
    return _identity_pallas_2d(x2d).reshape(orig_shape)


if __name__ == "__main__":
    key = jax.random.PRNGKey(0)
    # NCHW-style input, small shapes: batch=2, channels=4, spatial=16x16.
    x = jax.random.normal(key, (2, 4, 16, 16), dtype=jnp.float32)

    y = identity(x)
    jax.block_until_ready(y)

    assert y.shape == x.shape, (y.shape, x.shape)
    assert y.dtype == x.dtype, (y.dtype, x.dtype)
    assert bool(jnp.all(y == x)), "identity kernel output mismatch"

    print("KERNEL_OK")
</pallas_src>

<mosaic_0001>
module attributes {stable_mosaic.version = 11 : i64} {
  func.func @kernel(%arg0: memref<2x1024xf32, #tpu.memory_space<any>>, %arg1: memref<2x1024xf32, #tpu.memory_space<any>>, %arg2: memref<1x!tpu.dma_semaphore, #tpu.memory_space<semaphore_mem>>) attributes {dimension_semantics = [], scalar_prefetch = 0 : i64, scratch_operands = 1 : i64, tpu.core_type = #tpu.core_type<tc>} {
    %c0_i32 = arith.constant 0 : i32
    %c0_i32_0 = arith.constant 0 : i32
    %c0_i32_1 = arith.constant 0 : i32
    %0 = tpu.memref_slice %arg0[%c0_i32_0, %c0_i32_1] : memref<2x1024xf32, #tpu.memory_space<any>> -> memref<2x1024xf32, #tpu.memory_space<any>>
    %c0_i32_2 = arith.constant 0 : i32
    %c0_i32_3 = arith.constant 0 : i32
    %1 = tpu.memref_slice %arg1[%c0_i32_2, %c0_i32_3] : memref<2x1024xf32, #tpu.memory_space<any>> -> memref<2x1024xf32, #tpu.memory_space<any>>
    %2 = tpu.memref_slice %arg2[%c0_i32] : memref<1x!tpu.dma_semaphore, #tpu.memory_space<semaphore_mem>> -> memref<1x!tpu.dma_semaphore, #tpu.memory_space<semaphore_mem>>
    %3 = tpu.memref_squeeze %2 : memref<1x!tpu.dma_semaphore, #tpu.memory_space<semaphore_mem>> -> memref<!tpu.dma_semaphore, #tpu.memory_space<semaphore_mem>>
    tpu.enqueue_dma source(%0 : memref<2x1024xf32, #tpu.memory_space<any>>) target(%1 : memref<2x1024xf32, #tpu.memory_space<any>>) target_semaphore(%3 : memref<!tpu.dma_semaphore, #tpu.memory_space<semaphore_mem>>)
    %c0_i32_4 = arith.constant 0 : i32
    %c0_i32_5 = arith.constant 0 : i32
    %c0_i32_6 = arith.constant 0 : i32
    %4 = tpu.memref_slice %arg0[%c0_i32_5, %c0_i32_6] : memref<2x1024xf32, #tpu.memory_space<any>> -> memref<2x1024xf32, #tpu.memory_space<any>>
    %c0_i32_7 = arith.constant 0 : i32
    %c0_i32_8 = arith.constant 0 : i32
    %5 = tpu.memref_slice %arg1[%c0_i32_7, %c0_i32_8] : memref<2x1024xf32, #tpu.memory_space<any>> -> memref<2x1024xf32, #tpu.memory_space<any>>
    %6 = tpu.memref_slice %arg2[%c0_i32_4] : memref<1x!tpu.dma_semaphore, #tpu.memory_space<semaphore_mem>> -> memref<1x!tpu.dma_semaphore, #tpu.memory_space<semaphore_mem>>
    %7 = tpu.memref_squeeze %6 : memref<1x!tpu.dma_semaphore, #tpu.memory_space<semaphore_mem>> -> memref<!tpu.dma_semaphore, #tpu.memory_space<semaphore_mem>>
    tpu.wait_dma2 semaphore(%7 : memref<!tpu.dma_semaphore, #tpu.memory_space<semaphore_mem>>) src(%4 : memref<2x1024xf32, #tpu.memory_space<any>>) dst(%5 : memref<2x1024xf32, #tpu.memory_space<any>>)
    return
  }
}

</mosaic_0001>

<bundles_post_ra>
// kernel: _identity_pallas_2d.1
= control target key start
LH: loop header
LB: loop body
LE: loop exit
PB: predicated region body
PF: predicated region fallthrough
CT: control target
= control target key end

     0   :  { %s35_s6 = smov [#allocation2]   ;;  %s36_s7 = smov [#allocation3]   ;;  %s54_s0 = inlined_call_operand.hbm [shape: f32[2,1024], index: 0, kind: input, shape index: {}]   ;;  %s55_s1 = inlined_call_operand.hbm [shape: f32[2,1024], index: 1, kind: output, shape index: {}]  }
   0x1   :  { %s37_s8 = smov 0  }
   0x2   :  { %18 = dma.general %s54_s0, 256, %s55_s1, %s35_s6, %s36_s7, [#allocation4], %s37_s8, 0  }
   0x3   :  { %33 = dma.done.wait [#allocation2], 256 }
   0x4   :  { %34 = vsyncadd [#allocation2], 4294967040 }
   0x5   :  { %23 = vsyncmov [#allocation2] }
   0x8   :  { %s24_s13 = vpop.sfrf %23 }
   0x9   :  { %p29_p0 = scmp.ne.s32.totalorder %s24_s13, 0 }
   0xb   :  { %28 = shalt.err (%p29_p0)  }

</bundles_post_ra>
